<compile_context>
chip_gen: v5e
topology: v5e:2x2
jax: 0.10.0
libtpu: 0.0.40
codegen_flags: <defaults>
</compile_context>

<pallas_src>
import jax
import jax.numpy as jnp
from jax.experimental import pallas as pl
from jax.experimental.pallas import tpu as pltpu


def _hard_act_kernel(tau_ref, z_ref, o_ref):
    # tau_ref: (1, 1) float32 scalar resident in SMEM.
    # z_ref / o_ref: (row_block, cols) tiles in VMEM.
    tau = tau_ref[0, 0]
    z = z_ref[...]
    # Compare in float32 (PyTorch promotes against the float32 Parameter).
    gate = jnp.abs(z).astype(jnp.float32) > tau
    # Multiply by the float mask (not jnp.where) so NaN inputs propagate,
    # exactly matching `z * (|z| > tau).float()` in PyTorch.
    o_ref[...] = z * gate.astype(z.dtype)


def _as_2d(z: jax.Array) -> jax.Array:
    """Reshape (no copy of element order) to a lane-dense 2-D view."""
    n = z.size
    # Prefer a last dim that is a multiple of 128 (unmasked lane-dense stores).
    for c in (2048, 1024, 512, 256, 128):
        if n % c == 0:
            return z.reshape(-1, c)
    # Fallback: collapse leading dims; block last dim == full extent is legal
    # even if it is not a multiple of 128.
    if z.ndim >= 2:
        return z.reshape(-1, z.shape[-1])
    return z.reshape(1, -1) if z.ndim == 1 else z.reshape(1, 1)


def hard_act(z: jax.Array, tau: jax.Array) -> jax.Array:
    """Elementwise hard-threshold activation: z * (|z| > tau)."""
    orig_shape = z.shape

    x2d = _as_2d(z)
    rows, cols = x2d.shape

    itemsize = jnp.dtype(z.dtype).itemsize
    # Sublane-packed row multiple per dtype: 8 (f32), 16 (bf16), 32 (int8).
    sublane = max(8, 32 // itemsize)

    # ~1 MiB per input tile -> in+out double-buffered ≈ 4 MiB VMEM total,
    # comfortably under every generation's scoped-VMEM default.
    target_bytes = 1 << 20
    rb = target_bytes // max(1, cols * itemsize)
    if rb >= rows:
        row_block = rows                       # single block == full extent
    else:
        row_block = max(sublane, (rb // sublane) * sublane)
        row_block = min(row_block, rows)

    grid = (pl.cdiv(rows, row_block),)

    tau_smem = jnp.asarray(tau, dtype=jnp.float32).reshape(1, 1)

    out2d = pl.pallas_call(
        _hard_act_kernel,
        out_shape=jax.ShapeDtypeStruct((rows, cols), z.dtype),
        grid=grid,
        in_specs=[
            pl.BlockSpec(memory_space=pltpu.SMEM),               # tau scalar (whole)
            pl.BlockSpec((row_block, cols), lambda i: (i, 0)),   # z row tiles
        ],
        out_specs=pl.BlockSpec((row_block, cols), lambda i: (i, 0)),
        compiler_params=pltpu.CompilerParams(
            dimension_semantics=("parallel",),   # lets v7x shard rows across 2 TCs
        ),
    )(tau_smem, x2d)

    return out2d.reshape(orig_shape)


class HardActPallas:
    """Mirror of the PyTorch HardAct module (forward only)."""

    def __init__(self, in_features: int, tau=None):
        self.in_features = in_features
        # Matches the PyTorch __init__: tau defaults to 0.0 if not given.
        self.tau = jnp.asarray(0.0 if tau is None else tau, dtype=jnp.float32)

    def __call__(self, z: jax.Array) -> jax.Array:
        return hard_act(z, self.tau)


def _ref(x, tau):
    gate = jnp.abs(x).astype(jnp.float32) > jnp.asarray(tau, jnp.float32)
    return x * gate.astype(x.dtype)


if __name__ == "__main__":
    key = jax.random.PRNGKey(0)

    # Small NCHW input consistent with an MNIST-style conv feature map.
    x = jax.random.normal(key, (2, 4, 16, 16), dtype=jnp.float32) * 3.0

    # Nonzero tau so the thresholding actually does something.
    module = HardActPallas(in_features=4 * 16 * 16, tau=2.0)
    out = jax.block_until_ready(module(x))
    assert out.shape == x.shape and out.dtype == x.dtype
    assert jnp.allclose(out, _ref(x, module.tau)), "mismatch vs reference"

    # Default (tau=None -> 0.0) path.
    module0 = HardActPallas(in_features=4 * 16 * 16)
    out0 = jax.block_until_ready(module0(x))
    assert jnp.allclose(out0, _ref(x, module0.tau)), "mismatch vs reference (tau=0)"

    # Slightly larger input that exercises the multi-block row grid
    # (folds to (256, 2048) f32 -> row_block=128 -> grid=(2,)).
    key2 = jax.random.PRNGKey(0)
    xl = jax.random.normal(key2, (16, 8, 32, 128), dtype=jnp.float32) * 3.0
    outl = jax.block_until_ready(module(xl))
    assert jnp.allclose(outl, _ref(xl, module.tau)), "mismatch vs reference (grid)"

    # bfloat16 path (float32 comparison, bf16 output).
    xb = (jax.random.normal(key, (2, 4, 16, 16), dtype=jnp.float32) * 3.0).astype(
        jnp.bfloat16
    )
    outb = jax.block_until_ready(module(xb))
    assert outb.dtype == jnp.bfloat16
    assert jnp.allclose(
        outb.astype(jnp.float32), _ref(xb, module.tau).astype(jnp.float32)
    ), "mismatch vs reference (bf16)"

    print("KERNEL_OK")
</pallas_src>

<mosaic_0001>
module attributes {stable_mosaic.version = 11 : i64} {
  func.func @_hard_act_kernel(%arg0: i32, %arg1: memref<1x1xf32, #tpu.memory_space<smem>>, %arg2: memref<1x2048xf32, #tpu.memory_space<vmem>>, %arg3: memref<1x2048xf32, #tpu.memory_space<vmem>>) attributes {dimension_semantics = [#tpu.dimension_semantics<parallel>], iteration_bounds = array<i64: 1>, scalar_prefetch = 0 : i64, scratch_operands = 0 : i64, tpu.core_type = #tpu.core_type<tc>, window_params = [{transform_indices = @transform_0, window_bounds = array<i64: 1, 1>}, {transform_indices = @transform_1, window_bounds = array<i64: 1, 2048>}, {transform_indices = @transform_2, window_bounds = array<i64: 1, 2048>}]} {
    %c0 = arith.constant 0 : index
    %c0_0 = arith.constant 0 : index
    %0 = memref.load %arg1[%c0, %c0_0] : memref<1x1xf32, #tpu.memory_space<smem>>
    %c0_1 = arith.constant 0 : index
    %c0_2 = arith.constant 0 : index
    %1 = vector.load %arg2[%c0_1, %c0_2] : memref<1x2048xf32, #tpu.memory_space<vmem>>, vector<1x2048xf32>
    %2 = math.absf %1 : vector<1x2048xf32>
    %3 = vector.broadcast %0 : f32 to vector<1x2048xf32>
    %4 = arith.cmpf ogt, %2, %3 : vector<1x2048xf32>
    %5 = arith.extui %4 : vector<1x2048xi1> to vector<1x2048xi32>
    %6 = arith.sitofp %5 : vector<1x2048xi32> to vector<1x2048xf32>
    %7 = arith.mulf %1, %6 : vector<1x2048xf32>
    %c0_3 = arith.constant 0 : index
    %c0_4 = arith.constant 0 : index
    %8 = vector.load %arg3[%c0_3, %c0_4] : memref<1x2048xf32, #tpu.memory_space<vmem>>, vector<1x2048xf32>
    tpu.vector_store %arg3[%c0_3, %c0_4], %7 {strides = array<i32>} : memref<1x2048xf32, #tpu.memory_space<vmem>>, vector<1x2048xf32>,
    return
  }
  func.func @transform_0(%arg0: i32) -> (i32, i32) {
    %c0_i32 = arith.constant 0 : i32
    %c0_i32_0 = arith.constant 0 : i32
    %c0_i32_1 = arith.constant 0 : i32
    return %c0_i32, %c0_i32_0 : i32, i32
  }
  func.func @transform_1(%arg0: i32) -> (i32, i32) {
    %c0_i32 = arith.constant 0 : i32
    %c0_i32_0 = arith.constant 0 : i32
    return %arg0, %c0_i32 : i32, i32
  }
  func.func @transform_2(%arg0: i32) -> (i32, i32) {
    %c0_i32 = arith.constant 0 : i32
    %c0_i32_0 = arith.constant 0 : i32
    return %arg0, %c0_i32 : i32, i32
  }
}

</mosaic_0001>

<bundles_post_ra>
// kernel: tpu_custom_call.1
= control target key start
LH: loop header
LB: loop body
LE: loop exit
PB: predicated region body
PF: predicated region fallthrough
CT: control target
= control target key end

     0   :  { %8 = vsyncpa [#allocation4], 0  ;;  %s144_s0 = inlined_call_operand.<no memory space> [shape: f32[1,1], index: 0, kind: input, shape index: {}]   ;;  %s145_s1 = inlined_call_operand.hbm [shape: f32[1,2048], index: 1, kind: input, shape index: {}]   ;;  %s146_s2 = inlined_call_operand.hbm [shape: f32[1,2048], index: 2, kind: output, shape index: {}]  }
   0x1   :  { %9 = vsyncpa [#allocation5], 0  ;;  %s17_s11 = sshll.u32 %s145_s1, 4  ;;  %s117_s12 = smov [#allocation3]   ;;  %s18_s11 = int_to_ptr.hbm [resolvable:$true] %s17_s11 }
   0x2   :  { %s19_s13 = sshll.u32 %s117_s12, 4  ;;  %s20_s13 = int_to_ptr.vmem [resolvable:$true] %s19_s13 }
   0x3   :  { %22 = dma.hbm_to_vmem [thread:$0]  %s18_s11, 256, %s20_s13, [#allocation4]  }
   0x4   :  { %113 = dma.done.wait [#allocation4], 256  }
   0x5   :  { %114 = vsyncadd [#allocation4], 4294967040  ;;  %v28_v0 = vld [vmem:[#allocation3] sm:$0xff]  ;;  %v32_v1 = vstv %s144_s0  ;;  %v29_v2 = vld [vmem:[#allocation3 + $0x8] sm:$0xff]  ;;  %s118_s16 = smov [#allocation6]   ;;  %s50_s19 = sshll.u32 %s146_s2, 4  ;;  %s51_s19 = int_to_ptr.hbm [resolvable:$true] %s50_s19 }
   0x6   :  { %v30_v3 = vand.u32 2147483647, %v28_v0  ;;  %v31_v4 = vand.u32 2147483647, %v29_v2  ;;  %s48_s17 = sshll.u32 %s118_s16, 4  ;;  %v119_v5 = vmov 0.0   ;;  %s49_s17 = int_to_ptr.vmem [resolvable:$true] %s48_s17 }
   0x8   :  { %vm33_vm0 = vcmp.gt.f32.partialorder %v30_v3, %v32_v1  ;;  %vm34_vm1 = vcmp.gt.f32.partialorder %v31_v4, %v32_v1 }
   0x9   :  { %v60_v6 = vsel %vm33_vm0, 1.0, %v119_v5  ;;  %v61_v7 = vsel %vm34_vm1, 1.0, %v119_v5 }
   0xa   :  { %v39_v8 = vmul.f32 %v60_v6, %v28_v0  ;;  %v40_v9 = vmul.f32 %v61_v7, %v29_v2 }
   0xc   :  { %41 = vst [vmem:[#allocation6] sm:$0xff] %v39_v8 }
   0xd   :  { %42 = vst [vmem:[#allocation6 + $0x8] sm:$0xff] %v40_v9 }
   0xe   :  { %53 = dma.vmem_to_hbm [thread:$0]  %s49_s17, 256, %s51_s19, [#allocation5]  }
   0xf   :  { %115 = dma.done.wait [#allocation5], 256  }
  0x10   :  { %116 = vsyncadd [#allocation5], 4294967040 }
  0x11   :  { %58 = vsyncpa [#allocation4], 1 }
  0x12   :  { %59 = vsyncpa [#allocation5], 1 }

</bundles_post_ra>
